<compile_context>
chip_gen: v7x
topology: tpu7x:2x2x1
jax: 0.10.0
libtpu: 0.0.40
codegen_flags: <defaults>
</compile_context>

<pallas_src>
import functools
import math

import jax
import jax.numpy as jnp
from jax import lax
from jax.experimental import pallas as pl
from jax.experimental.pallas import tpu as pltpu

BN_EPS = 1e-5


def _round_up(a, b):
    return ((a + b - 1) // b) * b


def _vmem_limit_bytes():
    """Generation-aware scoped-VMEM limit: ~3/4 of physical VMEM, capped at 100 MiB."""
    phys = 64 << 20                      # conservative default (v7x per-core VMEM)
    try:
        info = pltpu.get_tpu_info()
        phys = int(getattr(info, "vmem_capacity_bytes", phys) or phys)
    except Exception:
        pass
    return int(min(phys * 3 // 4, 100 << 20))


def _largest_divisor(n, cap):
    cap = max(1, min(cap, n))
    for d in range(cap, 0, -1):
        if n % d == 0:
            return d
    return 1


def _single_buffered(block_shape, index_map):
    """Constant-index blocks only need one VMEM buffer."""
    try:
        return pl.BlockSpec(block_shape, index_map, pipeline_mode=pl.Buffered(1))
    except TypeError:                    # older BlockSpec without pipeline_mode
        return pl.BlockSpec(block_shape, index_map)


def _build_banded_weights(conv_w, wp_pad, dtype):
    """conv_w: (Cout, Cin, 3, 3) OIHW -> (3, wp_pad*Cin, wp_pad*Cout) banded mats.

    band[ky][xi*Cin + ci, xo*Cout + co] = w[co, ci, ky, kx] where xi = xo + (kx-1).
    (The non-wrapping eye drops out-of-range kx taps; at wp_pad == W+2 that only
    affects a discarded border column.)
    """
    cout, cin = conv_w.shape[0], conv_w.shape[1]
    bands = []
    for ky in range(3):
        band = jnp.zeros((wp_pad * cin, wp_pad * cout), jnp.float32)
        for kx in range(3):
            dx = kx - 1
            shift = jnp.eye(wp_pad, k=-dx, dtype=jnp.float32)  # shift[xi,xo]=1 iff xi=xo+dx
            tap = conv_w[:, :, ky, kx].T.astype(jnp.float32)   # (Cin, Cout)
            band = band + jnp.kron(shift, tap)
        bands.append(band)
    return jnp.stack(bands).astype(dtype)                      # (3, L_in, L_out)


def _make_conv_stats_kernel(H, W, cout, dot_dtype):
    cast = jnp.dtype(dot_dtype) != jnp.dtype(jnp.float32)

    def kernel(rgb_ref, t_ref, rgbt_ref, wb_ref, conv_ref, stats_ref):
        g, hp, l_in = rgb_ref.shape                      # (imgs, padded rows, W*Cin lanes)
        l_out = conv_ref.shape[-1]
        rows_total = g * hp

        # shallow fusion: RGB*RGBT + RGB + T*RGBT + T + RGBT
        fused = (rgb_ref[...] + t_ref[...]) * (rgbt_ref[...] + 1.0) + rgbt_ref[...]
        f2 = fused.reshape(rows_total, l_in)             # aligned leading-dim collapse

        # ky = 0 / 2 row taps via sublane rolls; wrapped rows only land on padded
        # border rows, which are masked out of the stats and discarded by the wrapper.
        f_dn = jnp.roll(f2, 1, axis=0)                   # f_dn[r] = f2[r-1]
        f_up = jnp.roll(f2, -1, axis=0)                  # f_up[r] = f2[r+1]
        if cast:                                         # bf16 MXU operands, f32 acc
            f2, f_dn, f_up = (a.astype(dot_dtype) for a in (f2, f_dn, f_up))

        # 3x3 conv as 3 banded matmuls accumulated directly into the output block
        # (no VMEM scratch, no extra full-tile copy).
        conv_ref[...] = jnp.dot(f_dn, wb_ref[0], preferred_element_type=jnp.float32)
        conv_ref[...] += jnp.dot(f2, wb_ref[1], preferred_element_type=jnp.float32)
        conv_ref[...] += jnp.dot(f_up, wb_ref[2], preferred_element_type=jnp.float32)

        # One-pass masked BN partials over the valid (interior) pixels only.
        acc3 = conv_ref[...].reshape(g, hp, l_out)
        rows = lax.broadcasted_iota(jnp.int32, acc3.shape, 1)   # row within each image
        cols = lax.broadcasted_iota(jnp.int32, acc3.shape, 2)   # lane = x*Cout + co
        valid = (rows >= 1) & (rows <= H) & (cols >= cout) & (cols < (W + 1) * cout)
        masked = jnp.where(valid, acc3, 0.0)
        s1 = jnp.sum(jnp.sum(masked, axis=1, keepdims=True), axis=0, keepdims=True)
        s2 = jnp.sum(jnp.sum(masked * masked, axis=1, keepdims=True), axis=0,
                     keepdims=True)
        stats_ref[:, 0:1, :] = s1                        # direct row stores, no concat
        stats_ref[:, 1:2, :] = s2

    return kernel


def _bn_relu_kernel(x_ref, mean_ref, inv_ref, o_ref):
    o_ref[...] = jnp.maximum((x_ref[...] - mean_ref[...]) * inv_ref[...], 0.0)


def shallow_fusion_forward(rgb, t, rgbt, conv_w, *, imgs_per_tile=None,
                           dot_dtype=jnp.float32,
                           input_format="NCHW", output_format="NCHW"):
    """conv_w: (Cout, Cin, 3, 3) OIHW.  Training-mode BN (batch statistics)."""
    if input_format == "NCHW":
        N, C, H, W = rgb.shape
    else:                                               # NHWC callers skip a transpose
        N, H, W, C = rgb.shape
    Cout = conv_w.shape[0]

    hp_pad = _round_up(H + 2, 8)                        # sublane alignment
    lane_unit = 128 // math.gcd(C, 128)
    wp_pad = _round_up(W + 2, lane_unit)                # lane-dense width
    L_in, L_out = wp_pad * C, wp_pad * Cout
    dot_bytes = jnp.dtype(dot_dtype).itemsize

    vmem_limit = _vmem_limit_bytes()
    budget = vmem_limit * 4 // 5                        # leave headroom under the limit

    # --- kernel A tile sizing: weight + temporaries + double-buffered I/O blocks ---
    weight_bytes = 3 * L_in * L_out * dot_bytes                       # Buffered(1)
    fixed = weight_bytes + 2 * 2 * L_out * 4 + (1 << 20)              # stats + headroom
    per_img = hp_pad * (2 * 3 * L_in * 4          # rgb/t/rgbt blocks, double-buffered
                        + L_in * 4                # fused temporary (f32)
                        + 2 * L_in * dot_bytes    # rolled copies (dot dtype)
                        + 2 * L_out * 4           # conv out block, double-buffered
                        + 4 * L_out * 4)          # iota / mask / masked temporaries
    auto_imgs = max(1, (budget - fixed) // per_img)
    if imgs_per_tile is None:
        t_min = min(4, N)                         # keep >= min(4, N) grid steps
        imgs_per_tile = min(auto_imgs, max(1, N // t_min), max(1, 4096 // hp_pad))
    imgs_per_tile = int(max(1, min(N, imgs_per_tile)))
    n_pad = _round_up(N, imgs_per_tile)
    num_tiles = n_pad // imgs_per_tile
    tile_rows = imgs_per_tile * hp_pad
    total_rows = n_pad * hp_pad

    def to_slab(x):
        if input_format == "NCHW":
            x = jnp.transpose(x, (0, 2, 3, 1))                          # -> NHWC
        x = x.astype(jnp.float32)
        x = jnp.pad(x, ((0, n_pad - N), (1, hp_pad - H - 1),
                        (1, wp_pad - W - 1), (0, 0)))                   # conv + align pad
        return x.reshape(n_pad, hp_pad, L_in)

    rgb2, t2, rgbt2 = to_slab(rgb), to_slab(t), to_slab(rgbt)
    wb = _build_banded_weights(conv_w, wp_pad, dot_dtype)               # (3, L_in, L_out)

    kernel_a = _make_conv_stats_kernel(H, W, Cout, dot_dtype)
    conv_slab, stats = pl.pallas_call(
        kernel_a,
        out_shape=(jax.ShapeDtypeStruct((total_rows, L_out), jnp.float32),
                   jax.ShapeDtypeStruct((num_tiles, 2, L_out), jnp.float32)),
        grid_spec=pltpu.PrefetchScalarGridSpec(
            num_scalar_prefetch=0,
            grid=(num_tiles,),
            in_specs=[
                pl.BlockSpec((imgs_per_tile, hp_pad, L_in), lambda i: (i, 0, 0)),
                pl.BlockSpec((imgs_per_tile, hp_pad, L_in), lambda i: (i, 0, 0)),
                pl.BlockSpec((imgs_per_tile, hp_pad, L_in), lambda i: (i, 0, 0)),
                _single_buffered((3, L_in, L_out), lambda i: (0, 0, 0)),
            ],
            out_specs=(
                pl.BlockSpec((tile_rows, L_out), lambda i: (i, 0)),
                pl.BlockSpec((1, 2, L_out), lambda i: (i, 0, 0)),
            ),
        ),
        compiler_params=pltpu.CompilerParams(
            dimension_semantics=("parallel",),
            vmem_limit_bytes=vmem_limit),
    )(rgb2, t2, rgbt2, wb)

    # Finalize BN statistics (tiny per-channel combine of the per-tile partials).
    # TODO(synk): use a Welford-style combine if |mean| >> std ever matters upstream.
    n_valid = float(N * H * W)
    s = stats.reshape(num_tiles, 2, wp_pad, Cout).sum(axis=(0, 2))      # (2, Cout)
    mean = s[0] / n_valid
    var = s[1] / n_valid - mean * mean
    inv = lax.rsqrt(var + BN_EPS)
    mean_lane = jnp.tile(mean, wp_pad).reshape(1, L_out)
    inv_lane = jnp.tile(inv, wp_pad).reshape(1, L_out)

    # --- kernel B: BN + ReLU, in place over the conv slab, own (larger) tile ---
    per_img_b = hp_pad * L_out * 4 * 4                  # in + out blocks, double-buffered
    cap_b = max(1, min(budget // per_img_b, max(1, 4096 // hp_pad),
                       max(1, n_pad // min(2, n_pad))))
    imgs_b = _largest_divisor(n_pad, cap_b)
    rows_b = imgs_b * hp_pad
    tiles_b = n_pad // imgs_b

    out_slab = pl.pallas_call(
        _bn_relu_kernel,
        out_shape=jax.ShapeDtypeStruct((total_rows, L_out), jnp.float32),
        grid_spec=pltpu.PrefetchScalarGridSpec(
            num_scalar_prefetch=0,
            grid=(tiles_b,),
            in_specs=[
                pl.BlockSpec((rows_b, L_out), lambda i: (i, 0)),
                _single_buffered((1, L_out), lambda i: (0, 0)),
                _single_buffered((1, L_out), lambda i: (0, 0)),
            ],
            out_specs=pl.BlockSpec((rows_b, L_out), lambda i: (i, 0)),
        ),
        input_output_aliases={0: 0},                    # overwrite conv slab in place
        compiler_params=pltpu.CompilerParams(
            dimension_semantics=("parallel",),
            vmem_limit_bytes=vmem_limit),
    )(conv_slab, mean_lane, inv_lane)

    out = out_slab.reshape(n_pad, hp_pad, wp_pad, Cout)[:N, 1:H + 1, 1:W + 1, :]
    if output_format == "NCHW":
        out = jnp.transpose(out, (0, 3, 1, 2))
    return out


def xavier_uniform(key, shape):
    # shape = (Cout, Cin, kh, kw), matches nn.init.xavier_uniform_ on a Conv2d weight
    fan_in = shape[1] * shape[2] * shape[3]
    fan_out = shape[0] * shape[2] * shape[3]
    bound = math.sqrt(6.0 / (fan_in + fan_out))
    return jax.random.uniform(key, shape, jnp.float32, -bound, bound)


def reference(rgb, t, rgbt, w):
    """Pure-JAX reference of the PyTorch forward (training-mode BN)."""
    fused = rgb * rgbt + rgb + t * rgbt + t + rgbt
    conv = lax.conv_general_dilated(fused, w, (1, 1), ((1, 1), (1, 1)),
                                    dimension_numbers=("NCHW", "OIHW", "NCHW"))
    mean = jnp.mean(conv, axis=(0, 2, 3), keepdims=True)
    var = jnp.mean((conv - mean) ** 2, axis=(0, 2, 3), keepdims=True)
    return jnp.maximum((conv - mean) * lax.rsqrt(var + BN_EPS), 0.0)


if __name__ == "__main__":
    N, C, H, W = 2, 4, 16, 16
    key = jax.random.PRNGKey(0)
    k1, k2, k3, kw = jax.random.split(key, 4)
    rgb = jax.random.normal(k1, (N, C, H, W), jnp.float32)
    t = jax.random.normal(k2, (N, C, H, W), jnp.float32)
    rgbt = jax.random.normal(k3, (N, C, H, W), jnp.float32)
    w = xavier_uniform(kw, (C, C, 3, 3))

    ref = reference(rgb, t, rgbt, w)

    # f32 MXU path (matches PyTorch numerics): 1 and 2 images per tile + auto sizing.
    for ipt in (1, 2, None):
        fwd = jax.jit(functools.partial(shallow_fusion_forward, imgs_per_tile=ipt))
        out = jax.block_until_ready(fwd(rgb, t, rgbt, w))
        assert out.shape == ref.shape == (N, C, H, W)
        max_err = float(jnp.max(jnp.abs(out - ref)))
        assert jnp.allclose(out, ref, atol=1e-4, rtol=1e-4), \
            f"imgs_per_tile={ipt}: max abs err {max_err}"

    # bf16 MXU operands (f32 accumulation): looser tolerance, smoke-checks the path.
    fwd_bf16 = jax.jit(functools.partial(shallow_fusion_forward,
                                         dot_dtype=jnp.bfloat16))
    out = jax.block_until_ready(fwd_bf16(rgb, t, rgbt, w))
    max_err = float(jnp.max(jnp.abs(out - ref)))
    assert max_err < 1e-1, f"bf16 path: max abs err {max_err}"

    print("KERNEL_OK")
</pallas_src>

<mosaic_0001>
module attributes {stable_mosaic.version = 11 : i64} {
  func.func @kernel(%arg0: i32, %arg1: memref<1x24x128xf32, #tpu.memory_space<vmem>>, %arg2: memref<1x24x128xf32, #tpu.memory_space<vmem>>, %arg3: memref<1x24x128xf32, #tpu.memory_space<vmem>>, %arg4: memref<3x128x128xf32, #tpu.memory_space<vmem>>, %arg5: memref<24x128xf32, #tpu.memory_space<vmem>>, %arg6: memref<1x2x128xf32, #tpu.memory_space<vmem>>) attributes {dimension_semantics = [#tpu.dimension_semantics<parallel>], iteration_bounds = array<i64: 2>, scalar_prefetch = 0 : i64, scratch_operands = 0 : i64, tpu.core_type = #tpu.core_type<tc>, window_params = [{transform_indices = @transform_0, window_bounds = array<i64: 1, 24, 128>}, {transform_indices = @transform_1, window_bounds = array<i64: 1, 24, 128>}, {transform_indices = @transform_2, window_bounds = array<i64: 1, 24, 128>}, {pipeline_mode = #tpu.pipeline_mode<synchronous>, transform_indices = @transform_3, window_bounds = array<i64: 3, 128, 128>}, {transform_indices = @transform_4, window_bounds = array<i64: 24, 128>}, {transform_indices = @transform_5, window_bounds = array<i64: 1, 2, 128>}]} {
    %c0 = arith.constant 0 : index
    %c0_0 = arith.constant 0 : index
    %c0_1 = arith.constant 0 : index
    %0 = vector.load %arg1[%c0, %c0_0, %c0_1] : memref<1x24x128xf32, #tpu.memory_space<vmem>>, vector<1x24x128xf32>
    %c0_2 = arith.constant 0 : index
    %c0_3 = arith.constant 0 : index
    %c0_4 = arith.constant 0 : index
    %1 = vector.load %arg2[%c0_2, %c0_3, %c0_4] : memref<1x24x128xf32, #tpu.memory_space<vmem>>, vector<1x24x128xf32>
    %2 = arith.addf %0, %1 : vector<1x24x128xf32>
    %c0_5 = arith.constant 0 : index
    %c0_6 = arith.constant 0 : index
    %c0_7 = arith.constant 0 : index
    %3 = vector.load %arg3[%c0_5, %c0_6, %c0_7] : memref<1x24x128xf32, #tpu.memory_space<vmem>>, vector<1x24x128xf32>
    %cst = arith.constant 1.000000e+00 : f32
    %4 = vector.broadcast %cst : f32 to vector<1x24x128xf32>
    %5 = arith.addf %3, %4 : vector<1x24x128xf32>
    %6 = arith.mulf %2, %5 : vector<1x24x128xf32>
    %c0_8 = arith.constant 0 : index
    %c0_9 = arith.constant 0 : index
    %c0_10 = arith.constant 0 : index
    %7 = vector.load %arg3[%c0_8, %c0_9, %c0_10] : memref<1x24x128xf32, #tpu.memory_space<vmem>>, vector<1x24x128xf32>
    %8 = arith.addf %6, %7 : vector<1x24x128xf32>
    %9 = vector.shape_cast %8 : vector<1x24x128xf32> to vector<24x128xf32>
    %10 = vector.extract_strided_slice %9 {offsets = [23, 0], sizes = [1, 128], strides = [1, 1]} : vector<24x128xf32> to vector<1x128xf32>
    %11 = vector.extract_strided_slice %9 {offsets = [0, 0], sizes = [23, 128], strides = [1, 1]} : vector<24x128xf32> to vector<23x128xf32>
    %12 = tpu.concatenate %10, %11 in 0 : vector<1x128xf32>, vector<23x128xf32> -> vector<24x128xf32>
    %13 = vector.extract_strided_slice %9 {offsets = [1, 0], sizes = [23, 128], strides = [1, 1]} : vector<24x128xf32> to vector<23x128xf32>
    %14 = vector.extract_strided_slice %9 {offsets = [0, 0], sizes = [1, 128], strides = [1, 1]} : vector<24x128xf32> to vector<1x128xf32>
    %15 = tpu.concatenate %13, %14 in 0 : vector<23x128xf32>, vector<1x128xf32> -> vector<24x128xf32>
    %c0_11 = arith.constant 0 : index
    %c0_12 = arith.constant 0 : index
    %c0_13 = arith.constant 0 : index
    %16 = vector.load %arg4[%c0_11, %c0_12, %c0_13] : memref<3x128x128xf32, #tpu.memory_space<vmem>>, vector<1x128x128xf32>
    %17 = vector.shape_cast %16 : vector<1x128x128xf32> to vector<128x128xf32>
    %cst_14 = arith.constant dense<0.000000e+00> : vector<24x128xf32>
    %18 = tpu.matmul %12, %17, %cst_14 {dimension_numbers = #tpu.dot_dimension_numbers<[1], [0], [0], [1], [0, 0, 1, 1], [], []>} : vector<24x128xf32>, vector<128x128xf32>, vector<24x128xf32> -> vector<24x128xf32>
    %c0_15 = arith.constant 0 : index
    %c0_16 = arith.constant 0 : index
    %19 = vector.load %arg5[%c0_15, %c0_16] : memref<24x128xf32, #tpu.memory_space<vmem>>, vector<24x128xf32>
    tpu.vector_store %arg5[%c0_15, %c0_16], %18 {strides = array<i32>} : memref<24x128xf32, #tpu.memory_space<vmem>>, vector<24x128xf32>,
    %c0_17 = arith.constant 0 : index
    %c0_18 = arith.constant 0 : index
    %20 = vector.load %arg5[%c0_17, %c0_18] : memref<24x128xf32, #tpu.memory_space<vmem>>, vector<24x128xf32>
    %c1 = arith.constant 1 : index
    %c0_19 = arith.constant 0 : index
    %c0_20 = arith.constant 0 : index
    %21 = vector.load %arg4[%c1, %c0_19, %c0_20] : memref<3x128x128xf32, #tpu.memory_space<vmem>>, vector<1x128x128xf32>
    %22 = vector.shape_cast %21 : vector<1x128x128xf32> to vector<128x128xf32>
    %cst_21 = arith.constant dense<0.000000e+00> : vector<24x128xf32>
    %23 = tpu.matmul %9, %22, %cst_21 {dimension_numbers = #tpu.dot_dimension_numbers<[1], [0], [0], [1], [0, 0, 1, 1], [], []>} : vector<24x128xf32>, vector<128x128xf32>, vector<24x128xf32> -> vector<24x128xf32>
    %24 = arith.addf %20, %23 : vector<24x128xf32>
    %c0_22 = arith.constant 0 : index
    %c0_23 = arith.constant 0 : index
    %25 = vector.load %arg5[%c0_22, %c0_23] : memref<24x128xf32, #tpu.memory_space<vmem>>, vector<24x128xf32>
    tpu.vector_store %arg5[%c0_22, %c0_23], %24 {strides = array<i32>} : memref<24x128xf32, #tpu.memory_space<vmem>>, vector<24x128xf32>,
    %c0_24 = arith.constant 0 : index
    %c0_25 = arith.constant 0 : index
    %26 = vector.load %arg5[%c0_24, %c0_25] : memref<24x128xf32, #tpu.memory_space<vmem>>, vector<24x128xf32>
    %c2 = arith.constant 2 : index
    %c0_26 = arith.constant 0 : index
    %c0_27 = arith.constant 0 : index
    %27 = vector.load %arg4[%c2, %c0_26, %c0_27] : memref<3x128x128xf32, #tpu.memory_space<vmem>>, vector<1x128x128xf32>
    %28 = vector.shape_cast %27 : vector<1x128x128xf32> to vector<128x128xf32>
    %cst_28 = arith.constant dense<0.000000e+00> : vector<24x128xf32>
    %29 = tpu.matmul %15, %28, %cst_28 {dimension_numbers = #tpu.dot_dimension_numbers<[1], [0], [0], [1], [0, 0, 1, 1], [], []>} : vector<24x128xf32>, vector<128x128xf32>, vector<24x128xf32> -> vector<24x128xf32>
    %30 = arith.addf %26, %29 : vector<24x128xf32>
    %c0_29 = arith.constant 0 : index
    %c0_30 = arith.constant 0 : index
    %31 = vector.load %arg5[%c0_29, %c0_30] : memref<24x128xf32, #tpu.memory_space<vmem>>, vector<24x128xf32>
    tpu.vector_store %arg5[%c0_29, %c0_30], %30 {strides = array<i32>} : memref<24x128xf32, #tpu.memory_space<vmem>>, vector<24x128xf32>,
    %c0_31 = arith.constant 0 : index
    %c0_32 = arith.constant 0 : index
    %32 = vector.load %arg5[%c0_31, %c0_32] : memref<24x128xf32, #tpu.memory_space<vmem>>, vector<24x128xf32>
    %33 = vector.shape_cast %32 : vector<24x128xf32> to vector<1x24x128xf32>
    %34 = tpu.iota {dimensions = array<i32: 1>} : vector<1x24x128xi32>
    %35 = tpu.iota {dimensions = array<i32: 2>} : vector<1x24x128xi32>
    %c1_i32 = arith.constant 1 : i32
    %36 = vector.broadcast %c1_i32 : i32 to vector<1x24x128xi32>
    %37 = arith.cmpi sge, %34, %36 : vector<1x24x128xi32>
    %c16_i32 = arith.constant 16 : i32
    %38 = vector.broadcast %c16_i32 : i32 to vector<1x24x128xi32>
    %39 = arith.cmpi sle, %34, %38 : vector<1x24x128xi32>
    %40 = arith.andi %37, %39 : vector<1x24x128xi1>
    %c4_i32 = arith.constant 4 : i32
    %41 = vector.broadcast %c4_i32 : i32 to vector<1x24x128xi32>
    %42 = arith.cmpi sge, %35, %41 : vector<1x24x128xi32>
    %43 = arith.andi %40, %42 : vector<1x24x128xi1>
    %c68_i32 = arith.constant 68 : i32
    %44 = vector.broadcast %c68_i32 : i32 to vector<1x24x128xi32>
    %45 = arith.cmpi slt, %35, %44 : vector<1x24x128xi32>
    %46 = arith.andi %43, %45 : vector<1x24x128xi1>
    %cst_33 = arith.constant 0.000000e+00 : f32
    %47 = vector.broadcast %cst_33 : f32 to vector<1x24x128xf32>
    %48 = arith.select %46, %33, %47 : vector<1x24x128xi1>, vector<1x24x128xf32>
    %cst_34 = arith.constant dense<0.000000e+00> : vector<1x128xf32>
    %49 = vector.multi_reduction <add>, %48, %cst_34 [1] : vector<1x24x128xf32> to vector<1x128xf32>
    %50 = vector.shape_cast %49 : vector<1x128xf32> to vector<1x1x128xf32>
    %cst_35 = arith.constant dense<0.000000e+00> : vector<1x128xf32>
    %51 = vector.multi_reduction <add>, %50, %cst_35 [0] : vector<1x1x128xf32> to vector<1x128xf32>
    %52 = vector.shape_cast %51 : vector<1x128xf32> to vector<1x1x128xf32>
    %53 = arith.mulf %48, %48 : vector<1x24x128xf32>
    %cst_36 = arith.constant dense<0.000000e+00> : vector<1x128xf32>
    %54 = vector.multi_reduction <add>, %53, %cst_36 [1] : vector<1x24x128xf32> to vector<1x128xf32>
    %55 = vector.shape_cast %54 : vector<1x128xf32> to vector<1x1x128xf32>
    %cst_37 = arith.constant dense<0.000000e+00> : vector<1x128xf32>
    %56 = vector.multi_reduction <add>, %55, %cst_37 [0] : vector<1x1x128xf32> to vector<1x128xf32>
    %57 = vector.shape_cast %56 : vector<1x128xf32> to vector<1x1x128xf32>
    %c0_38 = arith.constant 0 : index
    %c0_39 = arith.constant 0 : index
    %c0_40 = arith.constant 0 : index
    %58 = vector.load %arg6[%c0_38, %c0_39, %c0_40] : memref<1x2x128xf32, #tpu.memory_space<vmem>>, vector<1x1x128xf32>
    tpu.vector_store %arg6[%c0_38, %c0_39, %c0_40], %52 {strides = array<i32>} : memref<1x2x128xf32, #tpu.memory_space<vmem>>, vector<1x1x128xf32>,
    %c0_41 = arith.constant 0 : index
    %c1_42 = arith.constant 1 : index
    %c0_43 = arith.constant 0 : index
    %59 = vector.load %arg6[%c0_41, %c1_42, %c0_43] : memref<1x2x128xf32, #tpu.memory_space<vmem>>, vector<1x1x128xf32>
    tpu.vector_store %arg6[%c0_41, %c1_42, %c0_43], %57 {strides = array<i32>} : memref<1x2x128xf32, #tpu.memory_space<vmem>>, vector<1x1x128xf32>,
    return
  }
  func.func @transform_0(%arg0: i32) -> (i32, i32, i32) {
    %c0_i32 = arith.constant 0 : i32
    %c0_i32_0 = arith.constant 0 : i32
    %c0_i32_1 = arith.constant 0 : i32
    return %arg0, %c0_i32, %c0_i32_0 : i32, i32, i32
  }
  func.func @transform_1(%arg0: i32) -> (i32, i32, i32) {
    %c0_i32 = arith.constant 0 : i32
    %c0_i32_0 = arith.constant 0 : i32
    %c0_i32_1 = arith.constant 0 : i32
    return %arg0, %c0_i32, %c0_i32_0 : i32, i32, i32
  }
  func.func @transform_2(%arg0: i32) -> (i32, i32, i32) {
    %c0_i32 = arith.constant 0 : i32
    %c0_i32_0 = arith.constant 0 : i32
    %c0_i32_1 = arith.constant 0 : i32
    return %arg0, %c0_i32, %c0_i32_0 : i32, i32, i32
  }
  func.func @transform_3(%arg0: i32) -> (i32, i32, i32) {
    %c0_i32 = arith.constant 0 : i32
    %c0_i32_0 = arith.constant 0 : i32
    %c0_i32_1 = arith.constant 0 : i32
    %c0_i32_2 = arith.constant 0 : i32
    return %c0_i32, %c0_i32_0, %c0_i32_1 : i32, i32, i32
  }
  func.func @transform_4(%arg0: i32) -> (i32, i32) {
    %c0_i32 = arith.constant 0 : i32
    %c0_i32_0 = arith.constant 0 : i32
    return %arg0, %c0_i32 : i32, i32
  }
  func.func @transform_5(%arg0: i32) -> (i32, i32, i32) {
    %c0_i32 = arith.constant 0 : i32
    %c0_i32_0 = arith.constant 0 : i32
    %c0_i32_1 = arith.constant 0 : i32
    return %arg0, %c0_i32, %c0_i32_0 : i32, i32, i32
  }
}

module attributes {stable_mosaic.version = 11 : i64} {
  func.func @_bn_relu_kernel(%arg0: i32, %arg1: memref<24x128xf32, #tpu.memory_space<vmem>>, %arg2: memref<1x128xf32, #tpu.memory_space<vmem>>, %arg3: memref<1x128xf32, #tpu.memory_space<vmem>>, %arg4: memref<24x128xf32, #tpu.memory_space<vmem>>) attributes {dimension_semantics = [#tpu.dimension_semantics<parallel>], iteration_bounds = array<i64: 2>, scalar_prefetch = 0 : i64, scratch_operands = 0 : i64, tpu.core_type = #tpu.core_type<tc>, window_params = [{transform_indices = @transform_0, window_bounds = array<i64: 24, 128>}, {pipeline_mode = #tpu.pipeline_mode<synchronous>, transform_indices = @transform_1, window_bounds = array<i64: 1, 128>}, {pipeline_mode = #tpu.pipeline_mode<synchronous>, transform_indices = @transform_2, window_bounds = array<i64: 1, 128>}, {transform_indices = @transform_3, window_bounds = array<i64: 24, 128>}]} {
    %c0 = arith.constant 0 : index
    %c0_0 = arith.constant 0 : index
    %0 = vector.load %arg1[%c0, %c0_0] : memref<24x128xf32, #tpu.memory_space<vmem>>, vector<24x128xf32>
    %c0_1 = arith.constant 0 : index
    %c0_2 = arith.constant 0 : index
    %1 = vector.load %arg2[%c0_1, %c0_2] : memref<1x128xf32, #tpu.memory_space<vmem>>, vector<1x128xf32>
    %2 = vector.broadcast %1 : vector<1x128xf32> to vector<24x128xf32>
    %3 = arith.subf %0, %2 : vector<24x128xf32>
    %c0_3 = arith.constant 0 : index
    %c0_4 = arith.constant 0 : index
    %4 = vector.load %arg3[%c0_3, %c0_4] : memref<1x128xf32, #tpu.memory_space<vmem>>, vector<1x128xf32>
    %5 = vector.broadcast %4 : vector<1x128xf32> to vector<24x128xf32>
    %6 = arith.mulf %3, %5 : vector<24x128xf32>
    %cst = arith.constant 0.000000e+00 : f32
    %7 = vector.broadcast %cst : f32 to vector<24x128xf32>
    %8 = arith.maximumf %6, %7 : vector<24x128xf32>
    %c0_5 = arith.constant 0 : index
    %c0_6 = arith.constant 0 : index
    %9 = vector.load %arg4[%c0_5, %c0_6] : memref<24x128xf32, #tpu.memory_space<vmem>>, vector<24x128xf32>
    tpu.vector_store %arg4[%c0_5, %c0_6], %8 {strides = array<i32>} : memref<24x128xf32, #tpu.memory_space<vmem>>, vector<24x128xf32>,
    return
  }
  func.func @transform_0(%arg0: i32) -> (i32, i32) {
    %c0_i32 = arith.constant 0 : i32
    %c0_i32_0 = arith.constant 0 : i32
    return %arg0, %c0_i32 : i32, i32
  }
  func.func @transform_1(%arg0: i32) -> (i32, i32) {
    %c0_i32 = arith.constant 0 : i32
    %c0_i32_0 = arith.constant 0 : i32
    %c0_i32_1 = arith.constant 0 : i32
    return %c0_i32, %c0_i32_0 : i32, i32
  }
  func.func @transform_2(%arg0: i32) -> (i32, i32) {
    %c0_i32 = arith.constant 0 : i32
    %c0_i32_0 = arith.constant 0 : i32
    %c0_i32_1 = arith.constant 0 : i32
    return %c0_i32, %c0_i32_0 : i32, i32
  }
  func.func @transform_3(%arg0: i32) -> (i32, i32) {
    %c0_i32 = arith.constant 0 : i32
    %c0_i32_0 = arith.constant 0 : i32
    return %arg0, %c0_i32 : i32, i32
  }
}

</mosaic_0001>

<bundles_post_ra>
// kernel: tile.13
= control target key start
LH: loop header
LB: loop body
LE: loop exit
PB: predicated region body
PF: predicated region fallthrough
CT: control target
= control target key end

     0   :  { %s40_s0 = inlined_call_operand.vmem [shape: f32[4], index: 0, kind: input, shape index: {}]   ;;  %s41_s1 = inlined_call_operand.vmem [shape: f32[32,4], index: 1, kind: output, shape index: {}]  }
   0x1   :  { %v4_v0 = vld [vmem:[%s40_s0] ss:$0 sm:$0xff] }
   0x2   :  { %5 = vst [vmem:[%s41_s1] sm:$0xff] %v4_v0  ;;  %12 = vst [vmem:[%s41_s1 + $0x8] sm:$0xff] %v4_v0 }
   0x3   :  { %13 = vst [vmem:[%s41_s1 + $0x10] sm:$0xff] %v4_v0  ;;  %14 = vst [vmem:[%s41_s1 + $0x18] sm:$0xff] %v4_v0 }

// kernel: tile.14
= control target key start
LH: loop header
LB: loop body
LE: loop exit
PB: predicated region body
PF: predicated region fallthrough
CT: control target
= control target key end

     0   :  { %s259_s10 = smov 124   ;;  %s260_s11 = smov 116   ;;  %vm3_vm0 = vcmask 31744   ;;  %vm9_vm1 = vcmask 1048544   ;;  %vm15_vm2 = vcmask 1015744   ;;  %vm21_vm3 = vcmask 982944   ;;  %s399_s0 = inlined_call_operand.vmem [shape: f32[32,4], index: 0, kind: input, shape index: {}]   ;;  %s400_s1 = inlined_call_operand.vmem [shape: f32[1,128], index: 1, kind: output, shape index: {}]  }
   0x1   :  { %v197_v0 = vld [vmem:[%s399_s0 + $0x1f] sm:$0x1]   ;;  %v199_v1 = vld [vmem:[%s399_s0 + $0x1d] sm:$0x1]   ;;  %v198_v2 = vld [vmem:[%s399_s0 + $0x1e] sm:$0x1]  }
   0x2   :  { %7 = vrot.lane.b32.xlu0 %v197_v0, %s259_s10  ;;  %19 = vrot.lane.b32.xlu1 %v199_v1, %s260_s11  ;;  %v200_v3 = vld [vmem:[%s399_s0 + $0x1c] sm:$0x1]   ;;  %s261_s16 = smov 120   ;;  %s262_s17 = smov 112   ;;  %v201_v4 = vld [vmem:[%s399_s0 + $0x1b] sm:$0x1]  }
   0x3   :  { %v202_v5 = vld [vmem:[%s399_s0 + $0x1a] sm:$0x1]   ;;  %s263_s22 = smov 108   ;;  %s264_s23 = smov 104   ;;  %v203_v6 = vld [vmem:[%s399_s0 + $0x19] sm:$0x1]  }
   0x4   :  { %v204_v7 = vld [vmem:[%s399_s0 + $0x18] sm:$0x1]   ;;  %s265_s28 = smov 100   ;;  %s266_s29 = smov 96   ;;  %v205_v8 = vld [vmem:[%s399_s0 + $0x17] sm:$0x1]  }
   0x5   :  { %v206_v9 = vld [vmem:[%s399_s0 + $0x16] sm:$0x1]   ;;  %v2_v10 = vld [vmem:[%s399_s0] sm:$0x1]   ;;  %s267_s7 = smov 92   ;;  %s268_s8 = smov 88  }
   0x6   :  { %13 = vrot.lane.b32.xlu0 %v198_v2, %s261_s16  ;;  %25 = vrot.lane.b32.xlu1 %v200_v3, %s262_s17  ;;  %4 = vst.msk [vmem:[#allocation0] sm:$0x1] %vm3_vm0, %v2_v10   ;;  %v207_v11 = vld [vmem:[%s399_s0 + $0x15] sm:$0x1]   ;;  %v208_v12 = vld [vmem:[%s399_s0 + $0x14] sm:$0x1]  }
   0x7   :  { %s269_s13 = smov 84   ;;  %s270_s14 = smov 80   ;;  %v209_v13 = vld [vmem:[%s399_s0 + $0x13] sm:$0x1]   ;;  %v210_v14 = vld [vmem:[%s399_s0 + $0x12] sm:$0x1]  }
   0x8   :  { %s271_s19 = smov 76   ;;  %s272_s20 = smov 72   ;;  %v211_v15 = vld [vmem:[%s399_s0 + $0x11] sm:$0x1]   ;;  %v212_v16 = vld [vmem:[%s399_s0 + $0x10] sm:$0x1]  }
   0x9   :  { %s273_s25 = smov 68   ;;  %s274_s26 = smov 64   ;;  %v213_v17 = vld [vmem:[%s399_s0 + $0xf] sm:$0x1]   ;;  %v214_v18 = vld [vmem:[%s399_s0 + $0xe] sm:$0x1]  }
   0xa   :  { %31 = vrot.lane.b32.xlu0 %v201_v4, %s263_s22  ;;  %37 = vrot.lane.b32.xlu1 %v202_v5, %s264_s23  ;;  %s275_s2 = smov 60   ;;  %s276_s3 = smov 56   ;;  %v215_v19 = vld [vmem:[%s399_s0 + $0xd] sm:$0x1]   ;;  %v216_v20 = vld [vmem:[%s399_s0 + $0xc] sm:$0x1]  }
   0xb   :  { %s278_s9 = smov 48   ;;  %v217_v21 = vld [vmem:[%s399_s0 + $0xb] sm:$0x1]   ;;  %v218_v22 = vld [vmem:[%s399_s0 + $0xa] sm:$0x1]   ;;  %s280_s15 = smov 40  }
   0xc   :  { %v219_v23 = vld [vmem:[%s399_s0 + $0x9] sm:$0x1]   ;;  %v220_v24 = vld [vmem:[%s399_s0 + $0x8] sm:$0x1]   ;;  %s282_s21 = smov 32   ;;  %s284_s27 = smov 24  }
   0xd   :  { %v221_v25 = vld [vmem:[%s399_s0 + $0x7] sm:$0x1]   ;;  %v222_v26 = vld [vmem:[%s399_s0 + $0x6] sm:$0x1]   ;;  %v223_v27 = vld [vmem:[%s399_s0 + $0x5] sm:$0x1]  }
   0xe   :  { %43 = vrot.lane.b32.xlu0 %v203_v6, %s265_s28  ;;  %49 = vrot.lane.b32.xlu1 %v204_v7, %s266_s29  ;;  %v224_v28 = vld [vmem:[%s399_s0 + $0x4] sm:$0x1]   ;;  %s286_s4 = smov 16   ;;  %v225_v29 = vld [vmem:[%s399_s0 + $0x3] sm:$0x1]   ;;  %s288_s10 = smov 8  }
   0xf   :  { %v226_v30 = vld [vmem:[%s399_s0 + $0x2] sm:$0x1]   ;;  %v227_v31 = vld [vmem:[%s399_s0 + $0x1] sm:$0x1]   ;;  %s289_s0 = smov 4   ;;  %vm27_vm4 = vcmask 950144  }
  0x10   :  { %vm33_vm5 = vcmask 917344   ;;  %vm39_vm6 = vcmask 884544   ;;  %vm45_vm7 = vcmask 851744   ;;  %vm51_vm8 = vcmask 818944  }
  0x11   :  { %vm57_vm9 = vcmask 786144   ;;  %vm63_vm10 = vcmask 753344   ;;  %vm69_vm11 = vcmask 720544   ;;  %vm75_vm12 = vcmask 687744  }
  0x12   :  { %55 = vrot.lane.b32.xlu0 %v205_v8, %s267_s7  ;;  %61 = vrot.lane.b32.xlu1 %v206_v9, %s268_s8  ;;  %s277_s8 = smov 52   ;;  %vm81_vm13 = vcmask 654944   ;;  %vm87_vm14 = vcmask 622144   ;;  %vm93_vm15 = vcmask 589344   ;;  %vm99_vm0 = vcmask 556544  }
  0x16   :  { %67 = vrot.lane.b32.xlu0 %v207_v11, %s269_s13  ;;  %73 = vrot.lane.b32.xlu1 %v208_v12, %s270_s14  ;;  %s279_s14 = smov 44  }
  0x1a   :  { %79 = vrot.lane.b32.xlu0 %v209_v13, %s271_s19  ;;  %85 = vrot.lane.b32.xlu1 %v210_v14, %s272_s20  ;;  %s281_s20 = smov 36  }
  0x1e   :  { %91 = vrot.lane.b32.xlu0 %v211_v15, %s273_s25  ;;  %97 = vrot.lane.b32.xlu1 %v212_v16, %s274_s26  ;;  %s283_s26 = smov 28  }
  0x22   :  { %103 = vrot.lane.b32.xlu0 %v213_v17, %s275_s2  ;;  %109 = vrot.lane.b32.xlu1 %v214_v18, %s276_s3  ;;  %s285_s3 = smov 20  }
  0x26   :  { %115 = vrot.lane.b32.xlu0 %v215_v19, %s277_s8  ;;  %121 = vrot.lane.b32.xlu1 %v216_v20, %s278_s9  ;;  %s287_s9 = smov 12  }
  0x2a   :  { %127 = vrot.lane.b32.xlu0 %v217_v21, %s279_s14  ;;  %133 = vrot.lane.b32.xlu1 %v218_v22, %s280_s15 }
  0x2e   :  { %139 = vrot.lane.b32.xlu0 %v219_v23, %s281_s20  ;;  %145 = vrot.lane.b32.xlu1 %v220_v24, %s282_s21 }
  0x32   :  { %151 = vrot.lane.b32.xlu0 %v221_v25, %s283_s26  ;;  %157 = vrot.lane.b32.xlu1 %v222_v26, %s284_s27 }
  0x36   :  { %163 = vrot.lane.b32.xlu0 %v223_v27, %s285_s3  ;;  %169 = vrot.lane.b32.xlu1 %v224_v28, %s286_s4 }
  0x3a   :  { %175 = vrot.lane.b32.xlu0 %v225_v29, %s287_s9  ;;  %181 = vrot.lane.b32.xlu1 %v226_v30, %s288_s10 }
  0x3e   :  { %187 = vrot.lane.b32.xlu0 %v227_v31, %s289_s0 }
  0x74   :  { %v8_v32 = vpop.permute.xlu0 %7   ;;  %v20_v33 = vpop.permute.xlu1 %19  }
  0x75   :  { %10 = vst.msk [vmem:[#allocation0] sm:$0x1] %vm9_vm1, %v8_v32   ;;  %vm105_vm1 = vcmask 523744  }
  0x78   :  { %v14_v34 = vpop.permute.xlu0 %13   ;;  %v26_v35 = vpop.permute.xlu1 %25  }
  0x79   :  { %16 = vst.msk [vmem:[#allocation0] sm:$0x1] %vm15_vm2, %v14_v34   ;;  %vm111_vm2 = vcmask 490944  }
  0x7a   :  { %22 = vst.msk [vmem:[#allocation0] sm:$0x1] %vm21_vm3, %v20_v33   ;;  %vm117_vm3 = vcmask 458144  }
  0x7b   :  { %28 = vst.msk [vmem:[#allocation0] sm:$0x1] %vm27_vm4, %v26_v35   ;;  %vm123_vm4 = vcmask 425344  }
  0x7c   :  { %v32_v36 = vpop.permute.xlu0 %31   ;;  %v38_v37 = vpop.permute.xlu1 %37  }
  0x7d   :  { %34 = vst.msk [vmem:[#allocation0] sm:$0x1] %vm33_vm5, %v32_v36   ;;  %vm129_vm5 = vcmask 392544  }
  0x7e   :  { %40 = vst.msk [vmem:[#allocation0] sm:$0x1] %vm39_vm6, %v38_v37   ;;  %vm135_vm6 = vcmask 359744  }
  0x80   :  { %v44_v38 = vpop.permute.xlu0 %43   ;;  %v50_v39 = vpop.permute.xlu1 %49  }
  0x81   :  { %46 = vst.msk [vmem:[#allocation0] sm:$0x1] %vm45_vm7, %v44_v38   ;;  %vm141_vm7 = vcmask 326944  }
  0x82   :  { %52 = vst.msk [vmem:[#allocation0] sm:$0x1] %vm51_vm8, %v50_v39   ;;  %vm147_vm8 = vcmask 294144  }
  0x84   :  { %v56_v40 = vpop.permute.xlu0 %55   ;;  %v62_v41 = vpop.permute.xlu1 %61  }
  0x85   :  { %58 = vst.msk [vmem:[#allocation0] sm:$0x1] %vm57_vm9, %v56_v40   ;;  %vm153_vm9 = vcmask 261344  }
  0x86   :  { %64 = vst.msk [vmem:[#allocation0] sm:$0x1] %vm63_vm10, %v62_v41   ;;  %vm159_vm10 = vcmask 228544  }
  0x88   :  { %v68_v42 = vpop.permute.xlu0 %67   ;;  %v74_v43 = vpop.permute.xlu1 %73  }
  0x89   :  { %70 = vst.msk [vmem:[#allocation0] sm:$0x1] %vm69_vm11, %v68_v42   ;;  %vm165_vm11 = vcmask 195744  }
  0x8a   :  { %76 = vst.msk [vmem:[#allocation0] sm:$0x1] %vm75_vm12, %v74_v43   ;;  %vm171_vm12 = vcmask 162944  }
  0x8c   :  { %v80_v44 = vpop.permute.xlu0 %79   ;;  %v86_v45 = vpop.permute.xlu1 %85  }
  0x8d   :  { %82 = vst.msk [vmem:[#allocation0] sm:$0x1] %vm81_vm13, %v80_v44   ;;  %vm177_vm13 = vcmask 130144  }
  0x8e   :  { %88 = vst.msk [vmem:[#allocation0] sm:$0x1] %vm87_vm14, %v86_v45   ;;  %vm183_vm14 = vcmask 97344  }
  0x90   :  { %v92_v46 = vpop.permute.xlu0 %91   ;;  %v98_v47 = vpop.permute.xlu1 %97  }
  0x91   :  { %94 = vst.msk [vmem:[#allocation0] sm:$0x1] %vm93_vm15, %v92_v46   ;;  %vm189_vm15 = vcmask 64544  }
  0x92   :  { %100 = vst.msk [vmem:[#allocation0] sm:$0x1] %vm99_vm0, %v98_v47  }
  0x94   :  { %v104_v48 = vpop.permute.xlu0 %103   ;;  %v110_v49 = vpop.permute.xlu1 %109  }
  0x95   :  { %106 = vst.msk [vmem:[#allocation0] sm:$0x1] %vm105_vm1, %v104_v48  }
  0x96   :  { %112 = vst.msk [vmem:[#allocation0] sm:$0x1] %vm111_vm2, %v110_v49  }
  0x98   :  { %v116_v50 = vpop.permute.xlu0 %115   ;;  %v122_v51 = vpop.permute.xlu1 %121  }
  0x99   :  { %118 = vst.msk [vmem:[#allocation0] sm:$0x1] %vm117_vm3, %v116_v50  }
  0x9a   :  { %124 = vst.msk [vmem:[#allocation0] sm:$0x1] %vm123_vm4, %v122_v51  }
  0x9c   :  { %v128_v52 = vpop.permute.xlu0 %127   ;;  %v134_v53 = vpop.permute.xlu1 %133  }
  0x9d   :  { %130 = vst.msk [vmem:[#allocation0] sm:$0x1] %vm129_vm5, %v128_v52  }
  0x9e   :  { %136 = vst.msk [vmem:[#allocation0] sm:$0x1] %vm135_vm6, %v134_v53  }
  0xa0   :  { %v140_v54 = vpop.permute.xlu0 %139   ;;  %v146_v55 = vpop.permute.xlu1 %145  }
  0xa1   :  { %142 = vst.msk [vmem:[#allocation0] sm:$0x1] %vm141_vm7, %v140_v54  }
  0xa2   :  { %148 = vst.msk [vmem:[#allocation0] sm:$0x1] %vm147_vm8, %v146_v55  }
  0xa4   :  { %v152_v56 = vpop.permute.xlu0 %151   ;;  %v158_v57 = vpop.permute.xlu1 %157  }
  0xa5   :  { %154 = vst.msk [vmem:[#allocation0] sm:$0x1] %vm153_vm9, %v152_v56  }
  0xa6   :  { %160 = vst.msk [vmem:[#allocation0] sm:$0x1] %vm159_vm10, %v158_v57  }
  0xa8   :  { %v164_v58 = vpop.permute.xlu0 %163   ;;  %v170_v59 = vpop.permute.xlu1 %169  }
  0xa9   :  { %166 = vst.msk [vmem:[#allocation0] sm:$0x1] %vm165_vm11, %v164_v58  }
  0xaa   :  { %172 = vst.msk [vmem:[#allocation0] sm:$0x1] %vm171_vm12, %v170_v59  }
  0xac   :  { %v176_v60 = vpop.permute.xlu0 %175   ;;  %v182_v61 = vpop.permute.xlu1 %181  }
  0xad   :  { %178 = vst.msk [vmem:[#allocation0] sm:$0x1] %vm177_vm13, %v176_v60  }
  0xae   :  { %184 = vst.msk [vmem:[#allocation0] sm:$0x1] %vm183_vm14, %v182_v61  }
  0xb0   :  { %v188_v62 = vpop.permute.xlu0 %187  }
  0xb1   :  { %190 = vst.msk [vmem:[#allocation0] sm:$0x1] %vm189_vm15, %v188_v62  }
  0xb8   :  { %v194_v63 = vld [vmem:[#allocation0] sm:$0x1] }
  0xb9   :  { %196 = vst [vmem:[%s400_s1] sm:$0x1] %v194_v63 }

</bundles_post_ra>
